<compile_context>
chip_gen: v5e
topology: v5e:2x2
jax: 0.10.0
libtpu: 0.0.40
codegen_flags: <defaults>
</compile_context>

<pallas_src>
import functools

import jax
import jax.numpy as jnp
from jax.experimental import pallas as pl
from jax.experimental.pallas import tpu as pltpu


def _round_up(a, b):
    return pl.cdiv(a, b) * b


def generation_kernel(x_ref, w1_ref, b1_ref, w2_ref, b2_ref, o_ref,
                      h_ref, m_ref, l_ref, *, tn):
    # Grid = (row tiles i [parallel], vocab-column strips j [arbitrary]).
    #   x_ref : (tm, D)       row tile of the flattened input
    #   w1_ref: (D, Vp)       full first-layer weight (resident across grid)
    #   b1_ref: (1, Vp)
    #   w2_ref: (Vp, tn)      column strip of second-layer weight (streamed in j)
    #   b2_ref: (1, tn)       padded vocab columns carry -1e30 bias
    #   o_ref : (tm, Vp)      output row tile, resident across the j axis
    #   h_ref : (tm, Vp) f32  scratch: relu(x @ W1 + b1) for this row tile
    #   m_ref, l_ref: (tm, 1) online logsumexp statistics
    j = pl.program_id(1)

    # First linear + ReLU, computed once per row tile (dropout = identity).
    @pl.when(j == 0)
    def _():
        w1 = w1_ref[...]
        h = jnp.dot(x_ref[...].astype(w1.dtype), w1,
                    preferred_element_type=jnp.float32)
        h_ref[...] = jnp.maximum(h + b1_ref[...].astype(jnp.float32), 0.0)
        m_ref[...] = jnp.full_like(m_ref, -jnp.inf)
        l_ref[...] = jnp.zeros_like(l_ref)

    # Second linear for this vocab-column strip.
    w2 = w2_ref[...]
    y = jnp.dot(h_ref[...].astype(w2.dtype), w2,
                preferred_element_type=jnp.float32)
    y = y + b2_ref[...].astype(jnp.float32)

    # Online logsumexp across column strips.
    m_prev = m_ref[...]
    m_new = jnp.maximum(m_prev, jnp.max(y, axis=-1, keepdims=True))
    l_ref[...] = (l_ref[...] * jnp.exp(m_prev - m_new)
                  + jnp.sum(jnp.exp(y - m_new), axis=-1, keepdims=True))
    m_ref[...] = m_new

    # Stash raw logits for this strip into the resident, lane-dense output block.
    col = pl.multiple_of(j * tn, tn)
    o_ref[:, pl.ds(col, tn)] = y.astype(o_ref.dtype)

    # Normalize the whole row tile after the last strip; single HBM writeback.
    @pl.when(j == pl.num_programs(1) - 1)
    def _():
        lse = m_ref[...] + jnp.log(l_ref[...])
        o_ref[...] = (o_ref[...].astype(jnp.float32) - lse).astype(o_ref.dtype)


def generation_layer(x, w1, b1, w2, b2, *, tm=256, tn=512,
                     out_dtype=None, vmem_limit_bytes=None):
    """x: (B, S, D).  w1: (D, V), b1: (V,), w2: (V, V), b2: (V,).

    Weights may be bf16 (recommended on v6e/v7x); biases stay f32.
    Pass out_dtype=jnp.bfloat16 to halve the (M, V) output writeback.
    """
    B, S, D = x.shape
    V = w1.shape[1]
    out_dtype = x.dtype if out_dtype is None else out_dtype

    # Row tiling: large tm, clamped for tiny inputs; pad rows instead of asserting.
    M = B * S
    tm_eff = int(min(tm, _round_up(M, 8)))
    Mp = int(_round_up(M, tm_eff))

    # Vocab tiling: lane-dense (multiple of 128) column strips of W2.
    tn_eff = int(min(tn, _round_up(V, 128)))
    Vp = int(_round_up(V, tn_eff))

    NEG = jnp.float32(-1e30)  # pushes padded vocab columns out of the softmax

    x2 = jnp.zeros((Mp, D), x.dtype).at[:M].set(x.reshape(M, D))
    w1p = jnp.zeros((D, Vp), w1.dtype).at[:, :V].set(w1)
    b1p = jnp.zeros((1, Vp), jnp.float32).at[:, :V].set(
        b1.astype(jnp.float32)[None, :])
    w2p = jnp.zeros((Vp, Vp), w2.dtype).at[:V, :V].set(w2)
    b2p = jnp.full((1, Vp), NEG, jnp.float32).at[:, :V].set(
        b2.astype(jnp.float32)[None, :])

    grid = (Mp // tm_eff, Vp // tn_eff)

    cp_kwargs = dict(dimension_semantics=("parallel", "arbitrary"))
    if vmem_limit_bytes is not None:
        cp_kwargs["vmem_limit_bytes"] = vmem_limit_bytes

    out = pl.pallas_call(
        functools.partial(generation_kernel, tn=tn_eff),
        out_shape=jax.ShapeDtypeStruct((Mp, Vp), out_dtype),
        grid_spec=pltpu.PrefetchScalarGridSpec(
            num_scalar_prefetch=0,
            grid=grid,
            in_specs=[
                pl.BlockSpec((tm_eff, D), lambda i, j: (i, 0)),    # x row tile
                pl.BlockSpec((D, Vp), lambda i, j: (0, 0)),        # W1 (resident)
                pl.BlockSpec((1, Vp), lambda i, j: (0, 0)),        # b1
                pl.BlockSpec((Vp, tn_eff), lambda i, j: (0, j)),   # W2 column strip
                pl.BlockSpec((1, tn_eff), lambda i, j: (0, j)),    # b2 strip
            ],
            out_specs=pl.BlockSpec((tm_eff, Vp), lambda i, j: (i, 0)),
            scratch_shapes=[
                pltpu.VMEM((tm_eff, Vp), jnp.float32),  # h = relu(x@W1+b1)
                pltpu.VMEM((tm_eff, 1), jnp.float32),   # running max
                pltpu.VMEM((tm_eff, 1), jnp.float32),   # running sum(exp)
            ],
        ),
        compiler_params=pltpu.CompilerParams(**cp_kwargs),
    )(x2, w1p, b1p, w2p, b2p)

    return out[:M, :V].reshape(B, S, V)


def reference(x, w1, b1, w2, b2):
    h = jnp.maximum(x @ w1 + b1, 0.0)
    y = h @ w2 + b2
    return jax.nn.log_softmax(y, axis=-1)


if __name__ == "__main__":
    # Small shapes consistent with the module: batch=2, seq=8, dim_model=32, voc=64
    B, S, D, V = 2, 8, 32, 64
    key = jax.random.PRNGKey(0)
    kx, k1, k2, k3, k4 = jax.random.split(key, 5)

    x = jax.random.normal(kx, (B, S, D), dtype=jnp.float32)
    # PyTorch Linear stores weight as (out, in); we pass the transpose (in, out).
    w1 = jax.random.normal(k1, (D, V), dtype=jnp.float32) * (1.0 / jnp.sqrt(D))
    b1 = jax.random.normal(k2, (V,), dtype=jnp.float32) * 0.01
    w2 = jax.random.normal(k3, (V, V), dtype=jnp.float32) * (1.0 / jnp.sqrt(V))
    b2 = jax.random.normal(k4, (V,), dtype=jnp.float32) * 0.01

    ref = reference(x.reshape(B * S, D), w1, b1, w2, b2).reshape(B, S, V)

    # f32-operand path: tight check against the pure-JAX reference.
    out = generation_layer(x, w1, b1, w2, b2)
    jax.block_until_ready(out)
    assert out.shape == (B, S, V)
    assert jnp.allclose(out, ref, atol=1e-5, rtol=1e-5), "mismatch vs reference (f32)"

    # bf16-weight path (MXU-native operands on v6e/v7x): looser tolerance.
    out_bf16 = generation_layer(x, w1.astype(jnp.bfloat16), b1,
                                w2.astype(jnp.bfloat16), b2)
    jax.block_until_ready(out_bf16)
    assert out_bf16.shape == (B, S, V)
    assert bool(jnp.all(jnp.isfinite(out_bf16)))
    assert jnp.allclose(out_bf16, ref, atol=0.25, rtol=0.05), "mismatch vs reference (bf16)"

    print("KERNEL_OK")
</pallas_src>

<mosaic_0001>
module attributes {stable_mosaic.version = 11 : i64} {
  func.func @generation_kernel(%arg0: i32, %arg1: i32, %arg2: memref<16x32xf32, #tpu.memory_space<vmem>>, %arg3: memref<32x128xf32, #tpu.memory_space<vmem>>, %arg4: memref<1x128xf32, #tpu.memory_space<vmem>>, %arg5: memref<128x128xf32, #tpu.memory_space<vmem>>, %arg6: memref<1x128xf32, #tpu.memory_space<vmem>>, %arg7: memref<16x128xf32, #tpu.memory_space<vmem>>, %arg8: memref<16x128xf32, #tpu.memory_space<vmem>>, %arg9: memref<16x1xf32, #tpu.memory_space<vmem>>, %arg10: memref<16x1xf32, #tpu.memory_space<vmem>>) attributes {dimension_semantics = [#tpu.dimension_semantics<parallel>, #tpu.dimension_semantics<arbitrary>], iteration_bounds = array<i64: 1, 1>, scalar_prefetch = 0 : i64, scratch_operands = 3 : i64, tpu.core_type = #tpu.core_type<tc>, window_params = [{transform_indices = @transform_0, window_bounds = array<i64: 16, 32>}, {pipeline_mode = #tpu.pipeline_mode<synchronous>, transform_indices = @transform_1, window_bounds = array<i64: 32, 128>}, {pipeline_mode = #tpu.pipeline_mode<synchronous>, transform_indices = @transform_2, window_bounds = array<i64: 1, 128>}, {transform_indices = @transform_3, window_bounds = array<i64: 128, 128>}, {transform_indices = @transform_4, window_bounds = array<i64: 1, 128>}, {transform_indices = @transform_5, window_bounds = array<i64: 16, 128>}]} {
    %c0_i32 = arith.constant 0 : i32
    %0 = arith.cmpi eq, %arg1, %c0_i32 : i32
    %1 = arith.extui %0 : i1 to i32
    %c0_i32_0 = arith.constant 0 : i32
    %2 = arith.cmpi ne, %1, %c0_i32_0 : i32
    scf.if %2 {
      %c0_19 = arith.constant 0 : index
      %c0_20 = arith.constant 0 : index
      %32 = vector.load %arg3[%c0_19, %c0_20] : memref<32x128xf32, #tpu.memory_space<vmem>>, vector<32x128xf32>
      %c0_21 = arith.constant 0 : index
      %c0_22 = arith.constant 0 : index
      %33 = vector.load %arg2[%c0_21, %c0_22] : memref<16x32xf32, #tpu.memory_space<vmem>>, vector<16x32xf32>
      %cst_23 = arith.constant dense<0.000000e+00> : vector<16x128xf32>
      %34 = tpu.matmul %33, %32, %cst_23 {dimension_numbers = #tpu.dot_dimension_numbers<[1], [0], [0], [1], [0, 0, 1, 1], [], []>} : vector<16x32xf32>, vector<32x128xf32>, vector<16x128xf32> -> vector<16x128xf32>
      %c0_24 = arith.constant 0 : index
      %c0_25 = arith.constant 0 : index
      %35 = vector.load %arg4[%c0_24, %c0_25] : memref<1x128xf32, #tpu.memory_space<vmem>>, vector<1x128xf32>
      %36 = vector.broadcast %35 : vector<1x128xf32> to vector<16x128xf32>
      %37 = arith.addf %34, %36 : vector<16x128xf32>
      %cst_26 = arith.constant 0.000000e+00 : f32
      %38 = vector.broadcast %cst_26 : f32 to vector<16x128xf32>
      %39 = arith.maximumf %37, %38 : vector<16x128xf32>
      %c0_27 = arith.constant 0 : index
      %c0_28 = arith.constant 0 : index
      %40 = vector.load %arg8[%c0_27, %c0_28] : memref<16x128xf32, #tpu.memory_space<vmem>>, vector<16x128xf32>
      tpu.vector_store %arg8[%c0_27, %c0_28], %39 {strides = array<i32>} : memref<16x128xf32, #tpu.memory_space<vmem>>, vector<16x128xf32>,
      %cst_29 = arith.constant 0xFF800000 : f32
      %41 = vector.broadcast %cst_29 : f32 to vector<16x1xf32>
      %c0_30 = arith.constant 0 : index
      %c0_31 = arith.constant 0 : index
      %42 = vector.load %arg9[%c0_30, %c0_31] : memref<16x1xf32, #tpu.memory_space<vmem>>, vector<16x1xf32>
      tpu.vector_store %arg9[%c0_30, %c0_31], %41 {strides = array<i32>} : memref<16x1xf32, #tpu.memory_space<vmem>>, vector<16x1xf32>,
      %cst_32 = arith.constant 0.000000e+00 : f32
      %43 = vector.broadcast %cst_32 : f32 to vector<16x1xf32>
      %c0_33 = arith.constant 0 : index
      %c0_34 = arith.constant 0 : index
      %44 = vector.load %arg10[%c0_33, %c0_34] : memref<16x1xf32, #tpu.memory_space<vmem>>, vector<16x1xf32>
      tpu.vector_store %arg10[%c0_33, %c0_34], %43 {strides = array<i32>} : memref<16x1xf32, #tpu.memory_space<vmem>>, vector<16x1xf32>,
    } else {
    }
    %c0 = arith.constant 0 : index
    %c0_1 = arith.constant 0 : index
    %3 = vector.load %arg5[%c0, %c0_1] : memref<128x128xf32, #tpu.memory_space<vmem>>, vector<128x128xf32>
    %c0_2 = arith.constant 0 : index
    %c0_3 = arith.constant 0 : index
    %4 = vector.load %arg8[%c0_2, %c0_3] : memref<16x128xf32, #tpu.memory_space<vmem>>, vector<16x128xf32>
    %cst = arith.constant dense<0.000000e+00> : vector<16x128xf32>
    %5 = tpu.matmul %4, %3, %cst {dimension_numbers = #tpu.dot_dimension_numbers<[1], [0], [0], [1], [0, 0, 1, 1], [], []>} : vector<16x128xf32>, vector<128x128xf32>, vector<16x128xf32> -> vector<16x128xf32>
    %c0_4 = arith.constant 0 : index
    %c0_5 = arith.constant 0 : index
    %6 = vector.load %arg6[%c0_4, %c0_5] : memref<1x128xf32, #tpu.memory_space<vmem>>, vector<1x128xf32>
    %7 = vector.broadcast %6 : vector<1x128xf32> to vector<16x128xf32>
    %8 = arith.addf %5, %7 : vector<16x128xf32>
    %c0_6 = arith.constant 0 : index
    %c0_7 = arith.constant 0 : index
    %9 = vector.load %arg9[%c0_6, %c0_7] : memref<16x1xf32, #tpu.memory_space<vmem>>, vector<16x1xf32>
    %cst_8 = arith.constant dense<0xFF800000> : vector<16xf32>
    %10 = vector.multi_reduction <maximumf>, %8, %cst_8 [1] : vector<16x128xf32> to vector<16xf32>
    %11 = vector.shape_cast %10 : vector<16xf32> to vector<16x1xf32>
    %12 = arith.maximumf %9, %11 : vector<16x1xf32>
    %c0_9 = arith.constant 0 : index
    %c0_10 = arith.constant 0 : index
    %13 = vector.load %arg10[%c0_9, %c0_10] : memref<16x1xf32, #tpu.memory_space<vmem>>, vector<16x1xf32>
    %14 = arith.subf %9, %12 : vector<16x1xf32>
    %15 = math.exp %14 : vector<16x1xf32>
    %16 = arith.mulf %13, %15 : vector<16x1xf32>
    %17 = vector.broadcast %12 : vector<16x1xf32> to vector<16x128xf32>
    %18 = arith.subf %8, %17 : vector<16x128xf32>
    %19 = math.exp %18 : vector<16x128xf32>
    %cst_11 = arith.constant dense<0.000000e+00> : vector<16xf32>
    %20 = vector.multi_reduction <add>, %19, %cst_11 [1] : vector<16x128xf32> to vector<16xf32>
    %21 = vector.shape_cast %20 : vector<16xf32> to vector<16x1xf32>
    %22 = arith.addf %16, %21 : vector<16x1xf32>
    %c0_12 = arith.constant 0 : index
    %c0_13 = arith.constant 0 : index
    %23 = vector.load %arg10[%c0_12, %c0_13] : memref<16x1xf32, #tpu.memory_space<vmem>>, vector<16x1xf32>
    tpu.vector_store %arg10[%c0_12, %c0_13], %22 {strides = array<i32>} : memref<16x1xf32, #tpu.memory_space<vmem>>, vector<16x1xf32>,
    %c0_14 = arith.constant 0 : index
    %c0_15 = arith.constant 0 : index
    %24 = vector.load %arg9[%c0_14, %c0_15] : memref<16x1xf32, #tpu.memory_space<vmem>>, vector<16x1xf32>
    tpu.vector_store %arg9[%c0_14, %c0_15], %12 {strides = array<i32>} : memref<16x1xf32, #tpu.memory_space<vmem>>, vector<16x1xf32>,
    %c128_i32 = arith.constant 128 : i32
    %25 = arith.muli %arg1, %c128_i32 : i32
    %26 = tpu.assume_multiple %25, 128 : i32
    %c0_16 = arith.constant 0 : index
    %27 = arith.index_cast %26 : i32 to index
    %28 = vector.load %arg7[%c0_16, %27] : memref<16x128xf32, #tpu.memory_space<vmem>>, vector<16x128xf32>
    tpu.vector_store %arg7[%c0_16, %27], %8 {strides = array<i32>} : memref<16x128xf32, #tpu.memory_space<vmem>>, vector<16x128xf32>,
    %c0_i32_17 = arith.constant 0 : i32
    %29 = arith.cmpi eq, %arg1, %c0_i32_17 : i32
    %30 = arith.extui %29 : i1 to i32
    %c0_i32_18 = arith.constant 0 : i32
    %31 = arith.cmpi ne, %30, %c0_i32_18 : i32
    scf.if %31 {
      %c0_19 = arith.constant 0 : index
      %c0_20 = arith.constant 0 : index
      %32 = vector.load %arg9[%c0_19, %c0_20] : memref<16x1xf32, #tpu.memory_space<vmem>>, vector<16x1xf32>
      %c0_21 = arith.constant 0 : index
      %c0_22 = arith.constant 0 : index
      %33 = vector.load %arg10[%c0_21, %c0_22] : memref<16x1xf32, #tpu.memory_space<vmem>>, vector<16x1xf32>
      %34 = math.log %33 : vector<16x1xf32>
      %35 = arith.addf %32, %34 : vector<16x1xf32>
      %c0_23 = arith.constant 0 : index
      %c0_24 = arith.constant 0 : index
      %36 = vector.load %arg7[%c0_23, %c0_24] : memref<16x128xf32, #tpu.memory_space<vmem>>, vector<16x128xf32>
      %37 = vector.broadcast %35 : vector<16x1xf32> to vector<16x128xf32>
      %38 = arith.subf %36, %37 : vector<16x128xf32>
      %c0_25 = arith.constant 0 : index
      %c0_26 = arith.constant 0 : index
      %39 = vector.load %arg7[%c0_25, %c0_26] : memref<16x128xf32, #tpu.memory_space<vmem>>, vector<16x128xf32>
      tpu.vector_store %arg7[%c0_25, %c0_26], %38 {strides = array<i32>} : memref<16x128xf32, #tpu.memory_space<vmem>>, vector<16x128xf32>,
    } else {
    }
    return
  }
  func.func @transform_0(%arg0: i32, %arg1: i32) -> (i32, i32) {
    %c0_i32 = arith.constant 0 : i32
    %c0_i32_0 = arith.constant 0 : i32
    return %arg0, %c0_i32 : i32, i32
  }
  func.func @transform_1(%arg0: i32, %arg1: i32) -> (i32, i32) {
    %c0_i32 = arith.constant 0 : i32
    %c0_i32_0 = arith.constant 0 : i32
    %c0_i32_1 = arith.constant 0 : i32
    return %c0_i32, %c0_i32_0 : i32, i32
  }
  func.func @transform_2(%arg0: i32, %arg1: i32) -> (i32, i32) {
    %c0_i32 = arith.constant 0 : i32
    %c0_i32_0 = arith.constant 0 : i32
    %c0_i32_1 = arith.constant 0 : i32
    return %c0_i32, %c0_i32_0 : i32, i32
  }
  func.func @transform_3(%arg0: i32, %arg1: i32) -> (i32, i32) {
    %c0_i32 = arith.constant 0 : i32
    %c0_i32_0 = arith.constant 0 : i32
    return %c0_i32, %arg1 : i32, i32
  }
  func.func @transform_4(%arg0: i32, %arg1: i32) -> (i32, i32) {
    %c0_i32 = arith.constant 0 : i32
    %c0_i32_0 = arith.constant 0 : i32
    return %c0_i32, %arg1 : i32, i32
  }
  func.func @transform_5(%arg0: i32, %arg1: i32) -> (i32, i32) {
    %c0_i32 = arith.constant 0 : i32
    %c0_i32_0 = arith.constant 0 : i32
    return %arg0, %c0_i32 : i32, i32
  }
}

</mosaic_0001>

<bundles_post_ra>
// kernel: tpu_custom_call.1
= control target key start
LH: loop header
LB: loop body
LE: loop exit
PB: predicated region body
PF: predicated region fallthrough
CT: control target
= control target key end

     0   :  { %10 = vsyncpa [#allocation6], 0  ;;  %s501_s0 = inlined_call_operand.hbm [shape: f32[16,32], index: 0, kind: input, shape index: {}]   ;;  %s502_s1 = inlined_call_operand.hbm [shape: f32[32,128], index: 1, kind: input, shape index: {}]   ;;  %s503_s2 = inlined_call_operand.vmem [shape: f32[1,128], index: 2, kind: input, shape index: {}]   ;;  %s504_s3 = inlined_call_operand.hbm [shape: f32[128,128], index: 3, kind: input, shape index: {}]   ;;  %s505_s4 = inlined_call_operand.vmem [shape: f32[1,128], index: 4, kind: input, shape index: {}]   ;;  %s506_s5 = inlined_call_operand.hbm [shape: f32[16,128], index: 5, kind: output, shape index: {}]  }
   0x1   :  { %11 = vsyncpa [#allocation9], 0 }
   0x2   :  { %12 = vsyncpa [#allocation7], 0  ;;  %s30_s20 = sshll.u32 %s502_s1, 4  ;;  %s412_s21 = smov [#allocation8]   ;;  %s31_s20 = int_to_ptr.hbm [resolvable:$true] %s30_s20 }
   0x3   :  { %s32_s22 = sshll.u32 %s412_s21, 4  ;;  %s17_s25 = sshll.u32 %s501_s0, 4  ;;  %s33_s22 = int_to_ptr.vmem [resolvable:$true] %s32_s22  ;;  %s18_s25 = int_to_ptr.hbm [resolvable:$true] %s17_s25 }
   0x4   :  { %s413_s26 = smov 128   ;;  %s414_s27 = smov 8  }
   0x5   :  { %38 = dma.hbm_to_vmem [thread:$0]  %s31_s20, 512, %s33_s22, [#allocation9], %s413_s26, %s413_s26, %s414_s27  }
   0x6   :  { %s415_s28 = smov [#allocation5]   ;;  %s45_s1 = sshll.u32 %s504_s3, 4  ;;  %s46_s1 = int_to_ptr.hbm [resolvable:$true] %s45_s1 }
   0x7   :  { %s19_s29 = sshll.u32 %s415_s28, 4  ;;  %s416_s0 = smov [#allocation10]   ;;  %s20_s29 = int_to_ptr.vmem [resolvable:$true] %s19_s29 }
   0x8   :  { %25 = dma.hbm_to_vmem [thread:$0]  %s18_s25, 256, %s20_s29, [#allocation6], %s413_s26, %s413_s26, %s414_s27  }
   0x9   :  { %s47_s7 = sshll.u32 %s416_s0, 4  ;;  %s48_s7 = int_to_ptr.vmem [resolvable:$true] %s47_s7 }
   0xa   :  { %53 = dma.hbm_to_vmem [thread:$0]  %s46_s1, 2048, %s48_s7, [#allocation9], %s413_s26, %s413_s26, %s414_s27  }
   0xb   :  { %406 = dma.done.wait [#allocation6], 256  }
   0xc   :  { %407 = vsyncadd [#allocation6], 4294967040 }
   0xd   :  { %408 = dma.done.wait [#allocation9], 2560  }
   0xe   :  { %409 = vsyncadd [#allocation9], 4294964736  ;;  %v75_v0 = vld [vmem:[#allocation8 + $0x18] sm:$0xff]  ;;  %v74_v1 = vld [vmem:[#allocation8 + $0x10] sm:$0xff]  ;;  %vm82_vm0 = vcmask 261120   ;;  %vm116_vm1 = vcmask 7168  }
   0xf   :  { %101 = vmatpush.msra.mxu0 %v75_v0  ;;  %v73_v2 = vld [vmem:[#allocation8 + $0x8] sm:$0xff]  ;;  %v136_v3 = vld [vmem:[#allocation10 + $0x78] sm:$0xff]  ;;  %v135_v4 = vld [vmem:[#allocation10 + $0x70] sm:$0xff]  ;;  %v417_v29 = vmov -inf   ;;  %v418_v35 = vmov 0   ;;  %v419_v36 = vmov 0.0  }
  0x10   :  { %143 = vmatpush.msra.mxu1 %v136_v3  ;;  %v72_v5 = vld [vmem:[#allocation8] sm:$0xff]  ;;  %v134_v6 = vld [vmem:[#allocation10 + $0x68] sm:$0xff]  ;;  %269 = vmatpush.msra.mxu2 %v136_v3  ;;  %v76_v7 = vld [vmem:[#allocation5] sm:$0xff]  ;;  %117 = vst.msk [vmem:[#allocation3] sm:$0xff] %vm116_vm1, %v417_v29  ;;  %s252_s13 = sshll.u32 %s506_s5, 4  ;;  %s253_s13 = int_to_ptr.hbm [resolvable:$true] %s252_s13 }
  0x11   :  { %102 = vmatpush.msra.mxu0 %v74_v1  ;;  %v133_v8 = vld [vmem:[#allocation10 + $0x60] sm:$0xff]  ;;  %v132_v9 = vld [vmem:[#allocation10 + $0x58] sm:$0xff]  ;;  %v131_v10 = vld [vmem:[#allocation10 + $0x50] sm:$0xff]  ;;  %118 = vst.msk [vmem:[#allocation3 + $0x8] sm:$0xff] %vm116_vm1, %v417_v29  ;;  %294 = vset.pattern.permute.xlu1 %v418_v35 }
  0x12   :  { %144 = vmatpush.msra.mxu1 %v135_v4  ;;  %270 = vmatpush.msra.mxu2 %v135_v4  ;;  %v130_v11 = vld [vmem:[#allocation10 + $0x48] sm:$0xff]  ;;  %v77_v12 = vld [vmem:[#allocation5 + $0x8] sm:$0xff]  ;;  %v129_v13 = vld [vmem:[#allocation10 + $0x40] sm:$0xff]  ;;  %119 = vst.msk [vmem:[#allocation4] sm:$0xff] %vm116_vm1, %v419_v36 }
  0x13   :  { %103 = vmatpush.msra.mxu0 %v73_v2  ;;  %v128_v14 = vld [vmem:[#allocation10 + $0x38] sm:$0xff]  ;;  %v127_v15 = vld [vmem:[#allocation10 + $0x30] sm:$0xff]  ;;  %v126_v16 = vld [vmem:[#allocation10 + $0x28] sm:$0xff]  ;;  %295 = vset.pattern.permute.xlu0 %v418_v35  ;;  %120 = vst.msk [vmem:[#allocation4 + $0x8] sm:$0xff] %vm116_vm1, %v419_v36 }
  0x14   :  { %145 = vmatpush.msra.mxu1 %v134_v6  ;;  %271 = vmatpush.msra.mxu2 %v134_v6  ;;  %v125_v17 = vld [vmem:[#allocation10 + $0x20] sm:$0xff]  ;;  %v124_v18 = vld [vmem:[#allocation10 + $0x18] sm:$0xff]  ;;  %v123_v19 = vld [vmem:[#allocation10 + $0x10] sm:$0xff] }
  0x15   :  { %104 = vmatpush.msra.mxu0 %v72_v5  ;;  %v122_v20 = vld [vmem:[#allocation10 + $0x8] sm:$0xff]  ;;  %v121_v21 = vld [vmem:[#allocation10] sm:$0xff]  ;;  %v296_v22 = vld [vmem:[%s503_s2] ss:$0 sm:$0xff]  ;;  %s420_s2 = smov [#allocation11]  }
  0x16   :  { %267 = vmatmul.msk.f32.vlgmr.msra.gmra.mxu0 %vm82_vm0, %v76_v7  ;;  %146 = vmatpush.msra.mxu1 %v133_v8  ;;  %v297_v30 = vld [vmem:[%s505_s4] ss:$0 sm:$0xff]  ;;  %s250_s4 = sshll.u32 %s420_s2, 4  ;;  %s251_s4 = int_to_ptr.vmem [resolvable:$true] %s250_s4 }
  0x17   :  { %272 = vmatpush.msra.mxu2 %v133_v8  ;;  %v166_v37 = vld [vmem:[#allocation3] sm:$0xff] }
  0x18   :  { %147 = vmatpush.msra.mxu1 %v132_v9  ;;  %v167_v41 = vld [vmem:[#allocation3 + $0x8] sm:$0xff] }
  0x19   :  { %273 = vmatpush.msra.mxu2 %v132_v9  ;;  %v174_v55 = vld [vmem:[#allocation4] sm:$0xff] }
  0x1a   :  { %148 = vmatpush.msra.mxu1 %v131_v10  ;;  %v175_v61 = vld [vmem:[#allocation4 + $0x8] sm:$0xff] }
  0x1b   :  { %274 = vmatpush.msra.mxu2 %v131_v10 }
  0x1c   :  { %149 = vmatpush.msra.mxu1 %v130_v11 }
  0x1d   :  { %275 = vmatpush.msra.mxu2 %v130_v11 }
  0x1e   :  { %268 = vmatmul.msk.f32.gmra.mxu0 %vm82_vm0, %v77_v12  ;;  %150 = vmatpush.msra.mxu1 %v129_v13 }
  0x1f   :  { %276 = vmatpush.msra.mxu2 %v129_v13 }
  0x20   :  { %151 = vmatpush.msra.mxu1 %v128_v14 }
  0x21   :  { %277 = vmatpush.msra.mxu2 %v128_v14 }
  0x22   :  { %152 = vmatpush.msra.mxu1 %v127_v15 }
  0x23   :  { %278 = vmatpush.msra.mxu2 %v127_v15 }
  0x24   :  { %153 = vmatpush.msra.mxu1 %v126_v16 }
  0x25   :  { %279 = vmatpush.msra.mxu2 %v126_v16 }
  0x26   :  { %154 = vmatpush.msra.mxu1 %v125_v17 }
  0x27   :  { %280 = vmatpush.msra.mxu2 %v125_v17 }
  0x28   :  { %155 = vmatpush.msra.mxu1 %v124_v18 }
  0x29   :  { %281 = vmatpush.msra.mxu2 %v124_v18 }
  0x2a   :  { %156 = vmatpush.msra.mxu1 %v123_v19 }
  0x2b   :  { %282 = vmatpush.msra.mxu2 %v123_v19 }
  0x2c   :  { %157 = vmatpush.msra.mxu1 %v122_v20 }
  0x2d   :  { %283 = vmatpush.msra.mxu2 %v122_v20 }
  0x2e   :  { %158 = vmatpush.msra.mxu1 %v121_v21 }
  0x2f   :  { %284 = vmatpush.msra.mxu2 %v121_v21 }
  0x93   :  { %v106_v23 = vpop.f32.mrf.mxu0 }
  0x94   :  { %v107_v24 = vadd.f32 %v296_v22, %v106_v23 }
  0x96   :  { %v112_v25 = vmax.f32 %v107_v24, 0.0 }
  0x98   :  { %159 = vmatmul.f32.vlgmr.msra.gmra.mxu1 %v112_v25 }
  0x9b   :  { %v109_v26 = vpop.f32.mrf.mxu0 }
  0x9c   :  { %v110_v27 = vadd.f32 %v296_v22, %v109_v26 }
  0x9e   :  { %v113_v28 = vmax.f32 %v110_v27, 0.0 }
  0xa0   :  { %162 = vmatmul.f32.vlgmr.msra.gmra.mxu2 %v113_v28 }
 0x115   :  { %v160_v31 = vpop.f32.mrf.mxu1 }
 0x116   :  { %v479_v32 = vadd.f32 %v297_v30, %v160_v31 }
 0x118   :  { %168 = vmax.xlane.f32.xlu0 %v479_v32 }
 0x123   :  { %v163_v33 = vpop.f32.mrf.mxu2 }
 0x124   :  { %v482_v34 = vadd.f32 %v297_v30, %v163_v33 }
 0x126   :  { %170 = vmax.xlane.f32.xlu0 %v482_v34 }
 0x18b   :  { %v169_v38 = vpop.xlane.xlu0 %168 }
 0x18c   :  { %v172_v39 = vmax.f32 %v166_v37, %v169_v38 }
 0x18e   :  { %v176_v40 = vsub.f32 %v166_v37, %v172_v39  ;;  %209 = vst.msk [vmem:[#allocation3] sm:$0xff] %vm116_vm1, %v172_v39  ;;  %186 = vperm.xlu1 %294, %v172_v39  }
 0x190   :  { %v178_v53 = vmul.f32 1.442695, %v176_v40 }
 0x195   :  { %v220_v4 = vld [vmem:[#allocation3] sm:$0xff] }
 0x199   :  { %v171_v42 = vpop.xlane.xlu0 %170 }
 0x19a   :  { %v173_v43 = vmax.f32 %v167_v41, %v171_v42 }
 0x19c   :  { %v177_v44 = vsub.f32 %v167_v41, %v173_v43  ;;  %210 = vst.msk [vmem:[#allocation3 + $0x8] sm:$0xff] %vm116_vm1, %v173_v43  ;;  %191 = vperm.xlu1 %294, %v173_v43  }
 0x19e   :  { %v180_v57 = vmul.f32 1.442695, %v177_v44 }
 0x1a3   :  { %v221_v9 = vld [vmem:[#allocation3 + $0x8] sm:$0xff] }
 0x200   :  { %v187_v45 = vpop.permute.xlu1 %186 }
 0x201   :  { %v194_v46 = vsub.f32 %v479_v32, %v187_v45 }
 0x203   :  { %v196_v47 = vmul.f32 1.442695, %v194_v46 }
 0x205   :  { %298 = vpow2.f32 %v196_v47 }
 0x20b   :  { %v299_v48 = vpop.eup %298 }
 0x20c   :  { %200 = vadd.xlane.f32.xlu2 %v299_v48 }
 0x20e   :  { %v192_v49 = vpop.permute.xlu1 %191 }
 0x20f   :  { %v195_v50 = vsub.f32 %v482_v34, %v192_v49 }
 0x211   :  { %v198_v51 = vmul.f32 1.442695, %v195_v50 }
 0x213   :  { %300 = vpow2.f32 %v198_v51 }
 0x214   :  { %302 = vpow2.f32 %v178_v53 }
 0x215   :  { %304 = vpow2.f32 %v180_v57 }
 0x219   :  { %v301_v52 = vpop.eup %300 }
 0x21a   :  { %202 = vadd.xlane.f32.xlu2 %v301_v52  ;;  %v303_v54 = vpop.eup %302 }
 0x21b   :  { %v182_v56 = vmul.f32 %v303_v54, %v174_v55  ;;  %v305_v60 = vpop.eup %304 }
 0x21c   :  { %v183_v63 = vmul.f32 %v305_v60, %v175_v61 }
 0x27f   :  { %v201_v58 = vpop.xlane.xlu2 %200 }
 0x280   :  { %v204_v59 = vadd.f32 %v201_v58, %v182_v56 }
 0x282   :  { %207 = vst.msk [vmem:[#allocation4] sm:$0xff] %vm116_vm1, %v204_v59 }
 0x289   :  { %v222_v62 = vld [vmem:[#allocation4] sm:$0xff] }
 0x28a   :  { %306 = vlog2.f32 %v222_v62 }
 0x28d   :  { %v203_v0 = vpop.xlane.xlu2 %202 }
 0x28e   :  { %v205_v1 = vadd.f32 %v203_v0, %v183_v63 }
 0x290   :  { %v307_v2 = vpop.eup %306  ;;  %208 = vst.msk [vmem:[#allocation4 + $0x8] sm:$0xff] %vm116_vm1, %v205_v1 }
 0x291   :  { %v225_v3 = vmul.f32 0.6931472, %v307_v2 }
 0x293   :  { %v228_v5 = vadd.f32 %v225_v3, %v220_v4 }
 0x295   :  { %234 = vperm.xlu0 %295, %v228_v5  }
 0x297   :  { %v223_v6 = vld [vmem:[#allocation4 + $0x8] sm:$0xff] }
 0x298   :  { %308 = vlog2.f32 %v223_v6 }
 0x29e   :  { %v309_v7 = vpop.eup %308 }
 0x29f   :  { %v227_v8 = vmul.f32 0.6931472, %v309_v7 }
 0x2a1   :  { %v229_v10 = vadd.f32 %v227_v8, %v221_v9 }
 0x2a3   :  { %239 = vperm.xlu1 %294, %v229_v10  }
 0x307   :  { %v235_v11 = vpop.permute.xlu0 %234 }
 0x308   :  { %v242_v12 = vsub.f32 %v479_v32, %v235_v11 }
 0x30a   :  { %244 = vst [vmem:[#allocation11] sm:$0xff] %v242_v12 }
 0x315   :  { %v240_v13 = vpop.permute.xlu1 %239 }
 0x316   :  { %v243_v14 = vsub.f32 %v482_v34, %v240_v13 }
 0x318   :  { %245 = vst [vmem:[#allocation11 + $0x8] sm:$0xff] %v243_v14 }
 0x319   :  { %258 = dma.vmem_to_hbm [thread:$0]  %s251_s4, 256, %s253_s13, [#allocation7], %s413_s26, %s413_s26, %s414_s27  }
 0x31a   :  { %410 = dma.done.wait [#allocation7], 256  }
 0x31b   :  { %411 = vsyncadd [#allocation7], 4294967040 }
 0x31c   :  { %263 = vsyncpa [#allocation6], 1 }
 0x31d   :  { %264 = vsyncpa [#allocation9], 1 }
 0x31e   :  { %265 = vsyncpa [#allocation7], 1 }

</bundles_post_ra>
